<compile_context>
chip_gen: v5e
topology: v5e:2x2
jax: 0.10.0
libtpu: 0.0.40
codegen_flags: <defaults>
</compile_context>

<pallas_src>
import jax
import jax.numpy as jnp
from jax.experimental import pallas as pl
from jax.experimental.pallas import tpu as pltpu


def mlp_kernel(x_ref,
               w1_ref, b1_ref,
               w2_ref, b2_ref,
               w3_ref, b3_ref,
               w4_ref, b4_ref,
               w5_ref, b5_ref,
               o_ref):
    """One batch tile (feature-major) of the 5-layer MLP. Weights are VMEM-resident."""

    def dense_relu(h, w_ref, b_ref):
        # bf16 x bf16 matmul on the MXU with f32 accumulation; bias + ReLU in f32,
        # result stored bf16 so inter-layer activations stay half-width.
        acc = jnp.dot(w_ref[...], h, preferred_element_type=jnp.float32)  # (out, TB)
        return jnp.maximum(acc + b_ref[...], 0.0).astype(jnp.bfloat16)

    h = dense_relu(x_ref[...], w1_ref, b1_ref)   # (128, TB)
    h = dense_relu(h, w2_ref, b2_ref)            # (128, TB)
    h = dense_relu(h, w3_ref, b3_ref)            # (128, TB)
    h = dense_relu(h, w4_ref, b4_ref)            # (128, TB)

    # Output layer: (1, 128) @ (128, TB) -> lane-dense (1, TB) logits, no transpose.
    logit = jnp.dot(w5_ref[...], h, preferred_element_type=jnp.float32) + b5_ref[...]
    o_ref[...] = jax.nn.sigmoid(logit).astype(o_ref.dtype)   # exp/recip on EUP


def _round_up(n, m):
    return (n + m - 1) // m * m


def _resident(a):
    # Constant block index => no re-DMA across grid steps (weights stay in VMEM).
    return pl.BlockSpec(a.shape, lambda i: (0,) * a.ndim)


def prepare_params(params):
    """One-time (model-load) packing of PyTorch-layout params for the kernel.

    Weights stay in native (out, in) layout, cast to bf16; biases become f32
    column vectors (out, 1) so they broadcast along the lane (batch) axis.
    """
    packed = []
    for w, b in params:
        packed.append(w.astype(jnp.bfloat16))                 # (out, in) bf16
        packed.append(b.reshape(-1, 1).astype(jnp.float32))   # (out, 1)  f32
    return tuple(packed)


@jax.jit
def pytorch_nn_forward(x, packed_params):
    """x: (batch, in_features) f32; packed_params from prepare_params()."""
    batch, in_features = x.shape

    # Batch tile: multiple of 128, capped at 2048; when >=256 rows are live, pick
    # the tile so the grid has >=2 steps (lets v7x shard the parallel axis over
    # both TensorCores). Single-TC v5e/v6e are unaffected.
    b128 = _round_up(batch, 128)
    if b128 >= 256:
        tb = min(2048, _round_up(pl.cdiv(b128, 2), 128))
    else:
        tb = b128
    batch_pad = _round_up(b128, tb)

    # Feature-major bf16 activations: (in_features, batch_pad). Only this operand
    # streams over HBM each grid step.
    xt = x.astype(jnp.bfloat16).T
    if batch_pad != batch:
        xt = jnp.pad(xt, ((0, 0), (0, batch_pad - batch)))

    grid = (batch_pad // tb,)
    operands = (xt,) + packed_params
    in_specs = [pl.BlockSpec((in_features, tb), lambda i: (0, i))]   # streamed x
    in_specs += [_resident(a) for a in operands[1:]]                 # resident W/b

    out_t = pl.pallas_call(
        mlp_kernel,
        out_shape=jax.ShapeDtypeStruct((1, batch_pad), jnp.float32),
        grid_spec=pltpu.PrefetchScalarGridSpec(
            num_scalar_prefetch=0,
            grid=grid,
            in_specs=in_specs,
            out_specs=pl.BlockSpec((1, tb), lambda i: (0, i)),
        ),
        compiler_params=pltpu.CompilerParams(
            dimension_semantics=("parallel",),
            vmem_limit_bytes=32 * 1024 * 1024,
        ),
    )(*operands)

    # (1, batch_pad) lane-dense kernel output -> (batch, 1) like the PyTorch module.
    # Padded columns carry garbage and are sliced off here; never read past :batch.
    return out_t[:, :batch].T


def init_linear(key, fan_in, fan_out):
    """nn.Linear-style init, PyTorch layout: weight (out, in), bias (out,)."""
    kw, kb = jax.random.split(key)
    bound = 1.0 / jnp.sqrt(float(fan_in))
    w = jax.random.uniform(kw, (fan_out, fan_in), jnp.float32, -bound, bound)
    b = jax.random.uniform(kb, (fan_out,), jnp.float32, -bound, bound)
    return w, b


def reference_forward(x, params):
    """Pure-JAX reference matching the kernel's math exactly:
    bf16 operands, f32 MXU accumulation, f32 bias+ReLU, bf16 inter-layer h."""
    (w1, b1), (w2, b2), (w3, b3), (w4, b4), (w5, b5) = params

    def dense(h, w, b):
        return jnp.dot(h, w.T.astype(jnp.bfloat16),
                       preferred_element_type=jnp.float32) + b.reshape(1, -1)

    h = x.astype(jnp.bfloat16)
    h = jnp.maximum(dense(h, w1, b1), 0.0).astype(jnp.bfloat16)
    h = jnp.maximum(dense(h, w2, b2), 0.0).astype(jnp.bfloat16)
    h = jnp.maximum(dense(h, w3, b3), 0.0).astype(jnp.bfloat16)
    h = jnp.maximum(dense(h, w4, b4), 0.0).astype(jnp.bfloat16)
    return jax.nn.sigmoid(dense(h, w5, b5))


if __name__ == "__main__":
    key = jax.random.PRNGKey(0)
    k_in, k1, k2, k3, k4, k5 = jax.random.split(key, 6)

    batch = 8
    in_features = 32   # stand-in for X_train_flat.shape[1] (already standardized)
    hidden = 128
    out_features = 1

    x = jax.random.normal(k_in, (batch, in_features), jnp.float32)

    params = (
        init_linear(k1, in_features, hidden),
        init_linear(k2, hidden, hidden),
        init_linear(k3, hidden, hidden),
        init_linear(k4, hidden, out_features),
        init_linear(k5, hidden, out_features) if False else init_linear(k5, hidden, out_features),
    )
    # Correct layer sizes: hidden1..hidden4 are 128-wide, output is 1-wide.
    params = (
        init_linear(k1, in_features, hidden),
        init_linear(k2, hidden, hidden),
        init_linear(k3, hidden, hidden),
        init_linear(k4, hidden, hidden),
        init_linear(k5, hidden, out_features),
    )

    packed = prepare_params(params)           # one-time, outside the hot path

    out = pytorch_nn_forward(x, packed)
    out = jax.block_until_ready(out)

    ref = reference_forward(x, params)
    assert out.shape == (batch, out_features), out.shape
    assert jnp.allclose(out, ref, atol=1e-3, rtol=1e-3), \
        float(jnp.max(jnp.abs(out - ref)))

    print("KERNEL_OK")
</pallas_src>

<mosaic_0001>
module attributes {stable_mosaic.version = 11 : i64} {
  func.func @mlp_kernel(%arg0: i32, %arg1: memref<32x128xbf16, #tpu.memory_space<vmem>>, %arg2: memref<128x32xbf16, #tpu.memory_space<vmem>>, %arg3: memref<128x1xf32, #tpu.memory_space<vmem>>, %arg4: memref<128x128xbf16, #tpu.memory_space<vmem>>, %arg5: memref<128x1xf32, #tpu.memory_space<vmem>>, %arg6: memref<128x128xbf16, #tpu.memory_space<vmem>>, %arg7: memref<128x1xf32, #tpu.memory_space<vmem>>, %arg8: memref<128x128xbf16, #tpu.memory_space<vmem>>, %arg9: memref<128x1xf32, #tpu.memory_space<vmem>>, %arg10: memref<1x128xbf16, #tpu.memory_space<vmem>>, %arg11: memref<1x1xf32, #tpu.memory_space<vmem>>, %arg12: memref<1x128xf32, #tpu.memory_space<vmem>>) attributes {dimension_semantics = [#tpu.dimension_semantics<parallel>], iteration_bounds = array<i64: 1>, scalar_prefetch = 0 : i64, scratch_operands = 0 : i64, tpu.core_type = #tpu.core_type<tc>, window_params = [{transform_indices = @transform_0, window_bounds = array<i64: 32, 128>}, {pipeline_mode = #tpu.pipeline_mode<synchronous>, transform_indices = @transform_1, window_bounds = array<i64: 128, 32>}, {pipeline_mode = #tpu.pipeline_mode<synchronous>, transform_indices = @transform_2, window_bounds = array<i64: 128, 1>}, {pipeline_mode = #tpu.pipeline_mode<synchronous>, transform_indices = @transform_3, window_bounds = array<i64: 128, 128>}, {pipeline_mode = #tpu.pipeline_mode<synchronous>, transform_indices = @transform_4, window_bounds = array<i64: 128, 1>}, {pipeline_mode = #tpu.pipeline_mode<synchronous>, transform_indices = @transform_5, window_bounds = array<i64: 128, 128>}, {pipeline_mode = #tpu.pipeline_mode<synchronous>, transform_indices = @transform_6, window_bounds = array<i64: 128, 1>}, {pipeline_mode = #tpu.pipeline_mode<synchronous>, transform_indices = @transform_7, window_bounds = array<i64: 128, 128>}, {pipeline_mode = #tpu.pipeline_mode<synchronous>, transform_indices = @transform_8, window_bounds = array<i64: 128, 1>}, {pipeline_mode = #tpu.pipeline_mode<synchronous>, transform_indices = @transform_9, window_bounds = array<i64: 1, 128>}, {pipeline_mode = #tpu.pipeline_mode<synchronous>, transform_indices = @transform_10, window_bounds = array<i64: 1, 1>}, {transform_indices = @transform_11, window_bounds = array<i64: 1, 128>}]} {
    %c0 = arith.constant 0 : index
    %c0_0 = arith.constant 0 : index
    %0 = vector.load %arg1[%c0, %c0_0] : memref<32x128xbf16, #tpu.memory_space<vmem>>, vector<32x128xbf16>
    %c0_1 = arith.constant 0 : index
    %c0_2 = arith.constant 0 : index
    %1 = vector.load %arg2[%c0_1, %c0_2] : memref<128x32xbf16, #tpu.memory_space<vmem>>, vector<128x32xbf16>
    %cst = arith.constant dense<0.000000e+00> : vector<128x128xf32>
    %2 = tpu.matmul %1, %0, %cst {dimension_numbers = #tpu.dot_dimension_numbers<[1], [0], [0], [1], [0, 0, 1, 1], [], []>} : vector<128x32xbf16>, vector<32x128xbf16>, vector<128x128xf32> -> vector<128x128xf32>
    %c0_3 = arith.constant 0 : index
    %c0_4 = arith.constant 0 : index
    %3 = vector.load %arg3[%c0_3, %c0_4] : memref<128x1xf32, #tpu.memory_space<vmem>>, vector<128x1xf32>
    %4 = vector.broadcast %3 : vector<128x1xf32> to vector<128x128xf32>
    %5 = arith.addf %2, %4 : vector<128x128xf32>
    %cst_5 = arith.constant 0.000000e+00 : f32
    %6 = vector.broadcast %cst_5 : f32 to vector<128x128xf32>
    %7 = arith.maximumf %5, %6 : vector<128x128xf32>
    %8 = arith.truncf %7 : vector<128x128xf32> to vector<128x128xbf16>
    %c0_6 = arith.constant 0 : index
    %c0_7 = arith.constant 0 : index
    %9 = vector.load %arg4[%c0_6, %c0_7] : memref<128x128xbf16, #tpu.memory_space<vmem>>, vector<128x128xbf16>
    %cst_8 = arith.constant dense<0.000000e+00> : vector<128x128xf32>
    %10 = tpu.matmul %9, %8, %cst_8 {dimension_numbers = #tpu.dot_dimension_numbers<[1], [0], [0], [1], [0, 0, 1, 1], [], []>} : vector<128x128xbf16>, vector<128x128xbf16>, vector<128x128xf32> -> vector<128x128xf32>
    %c0_9 = arith.constant 0 : index
    %c0_10 = arith.constant 0 : index
    %11 = vector.load %arg5[%c0_9, %c0_10] : memref<128x1xf32, #tpu.memory_space<vmem>>, vector<128x1xf32>
    %12 = vector.broadcast %11 : vector<128x1xf32> to vector<128x128xf32>
    %13 = arith.addf %10, %12 : vector<128x128xf32>
    %cst_11 = arith.constant 0.000000e+00 : f32
    %14 = vector.broadcast %cst_11 : f32 to vector<128x128xf32>
    %15 = arith.maximumf %13, %14 : vector<128x128xf32>
    %16 = arith.truncf %15 : vector<128x128xf32> to vector<128x128xbf16>
    %c0_12 = arith.constant 0 : index
    %c0_13 = arith.constant 0 : index
    %17 = vector.load %arg6[%c0_12, %c0_13] : memref<128x128xbf16, #tpu.memory_space<vmem>>, vector<128x128xbf16>
    %cst_14 = arith.constant dense<0.000000e+00> : vector<128x128xf32>
    %18 = tpu.matmul %17, %16, %cst_14 {dimension_numbers = #tpu.dot_dimension_numbers<[1], [0], [0], [1], [0, 0, 1, 1], [], []>} : vector<128x128xbf16>, vector<128x128xbf16>, vector<128x128xf32> -> vector<128x128xf32>
    %c0_15 = arith.constant 0 : index
    %c0_16 = arith.constant 0 : index
    %19 = vector.load %arg7[%c0_15, %c0_16] : memref<128x1xf32, #tpu.memory_space<vmem>>, vector<128x1xf32>
    %20 = vector.broadcast %19 : vector<128x1xf32> to vector<128x128xf32>
    %21 = arith.addf %18, %20 : vector<128x128xf32>
    %cst_17 = arith.constant 0.000000e+00 : f32
    %22 = vector.broadcast %cst_17 : f32 to vector<128x128xf32>
    %23 = arith.maximumf %21, %22 : vector<128x128xf32>
    %24 = arith.truncf %23 : vector<128x128xf32> to vector<128x128xbf16>
    %c0_18 = arith.constant 0 : index
    %c0_19 = arith.constant 0 : index
    %25 = vector.load %arg8[%c0_18, %c0_19] : memref<128x128xbf16, #tpu.memory_space<vmem>>, vector<128x128xbf16>
    %cst_20 = arith.constant dense<0.000000e+00> : vector<128x128xf32>
    %26 = tpu.matmul %25, %24, %cst_20 {dimension_numbers = #tpu.dot_dimension_numbers<[1], [0], [0], [1], [0, 0, 1, 1], [], []>} : vector<128x128xbf16>, vector<128x128xbf16>, vector<128x128xf32> -> vector<128x128xf32>
    %c0_21 = arith.constant 0 : index
    %c0_22 = arith.constant 0 : index
    %27 = vector.load %arg9[%c0_21, %c0_22] : memref<128x1xf32, #tpu.memory_space<vmem>>, vector<128x1xf32>
    %28 = vector.broadcast %27 : vector<128x1xf32> to vector<128x128xf32>
    %29 = arith.addf %26, %28 : vector<128x128xf32>
    %cst_23 = arith.constant 0.000000e+00 : f32
    %30 = vector.broadcast %cst_23 : f32 to vector<128x128xf32>
    %31 = arith.maximumf %29, %30 : vector<128x128xf32>
    %32 = arith.truncf %31 : vector<128x128xf32> to vector<128x128xbf16>
    %c0_24 = arith.constant 0 : index
    %c0_25 = arith.constant 0 : index
    %33 = vector.load %arg10[%c0_24, %c0_25] : memref<1x128xbf16, #tpu.memory_space<vmem>>, vector<1x128xbf16>
    %cst_26 = arith.constant dense<0.000000e+00> : vector<1x128xf32>
    %34 = tpu.matmul %33, %32, %cst_26 {dimension_numbers = #tpu.dot_dimension_numbers<[1], [0], [0], [1], [0, 0, 1, 1], [], []>} : vector<1x128xbf16>, vector<128x128xbf16>, vector<1x128xf32> -> vector<1x128xf32>
    %c0_27 = arith.constant 0 : index
    %c0_28 = arith.constant 0 : index
    %35 = vector.load %arg11[%c0_27, %c0_28] : memref<1x1xf32, #tpu.memory_space<vmem>>, vector<1x1xf32>
    %36 = vector.broadcast %35 : vector<1x1xf32> to vector<1x128xf32>
    %37 = arith.addf %34, %36 : vector<1x128xf32>
    %38 = arith.negf %37 : vector<1x128xf32>
    %39 = math.exp %38 : vector<1x128xf32>
    %cst_29 = arith.constant 1.000000e+00 : f32
    %40 = vector.broadcast %cst_29 : f32 to vector<1x128xf32>
    %41 = arith.addf %40, %39 : vector<1x128xf32>
    %42 = arith.divf %40, %41 : vector<1x128xf32>
    %c0_30 = arith.constant 0 : index
    %c0_31 = arith.constant 0 : index
    %43 = vector.load %arg12[%c0_30, %c0_31] : memref<1x128xf32, #tpu.memory_space<vmem>>, vector<1x128xf32>
    tpu.vector_store %arg12[%c0_30, %c0_31], %42 {strides = array<i32>} : memref<1x128xf32, #tpu.memory_space<vmem>>, vector<1x128xf32>,
    return
  }
  func.func @transform_0(%arg0: i32) -> (i32, i32) {
    %c0_i32 = arith.constant 0 : i32
    %c0_i32_0 = arith.constant 0 : i32
    return %c0_i32, %arg0 : i32, i32
  }
  func.func @transform_1(%arg0: i32) -> (i32, i32) {
    %c0_i32 = arith.constant 0 : i32
    %c0_i32_0 = arith.constant 0 : i32
    %c0_i32_1 = arith.constant 0 : i32
    return %c0_i32, %c0_i32_0 : i32, i32
  }
  func.func @transform_2(%arg0: i32) -> (i32, i32) {
    %c0_i32 = arith.constant 0 : i32
    %c0_i32_0 = arith.constant 0 : i32
    %c0_i32_1 = arith.constant 0 : i32
    return %c0_i32, %c0_i32_0 : i32, i32
  }
  func.func @transform_3(%arg0: i32) -> (i32, i32) {
    %c0_i32 = arith.constant 0 : i32
    %c0_i32_0 = arith.constant 0 : i32
    %c0_i32_1 = arith.constant 0 : i32
    return %c0_i32, %c0_i32_0 : i32, i32
  }
  func.func @transform_4(%arg0: i32) -> (i32, i32) {
    %c0_i32 = arith.constant 0 : i32
    %c0_i32_0 = arith.constant 0 : i32
    %c0_i32_1 = arith.constant 0 : i32
    return %c0_i32, %c0_i32_0 : i32, i32
  }
  func.func @transform_5(%arg0: i32) -> (i32, i32) {
    %c0_i32 = arith.constant 0 : i32
    %c0_i32_0 = arith.constant 0 : i32
    %c0_i32_1 = arith.constant 0 : i32
    return %c0_i32, %c0_i32_0 : i32, i32
  }
  func.func @transform_6(%arg0: i32) -> (i32, i32) {
    %c0_i32 = arith.constant 0 : i32
    %c0_i32_0 = arith.constant 0 : i32
    %c0_i32_1 = arith.constant 0 : i32
    return %c0_i32, %c0_i32_0 : i32, i32
  }
  func.func @transform_7(%arg0: i32) -> (i32, i32) {
    %c0_i32 = arith.constant 0 : i32
    %c0_i32_0 = arith.constant 0 : i32
    %c0_i32_1 = arith.constant 0 : i32
    return %c0_i32, %c0_i32_0 : i32, i32
  }
  func.func @transform_8(%arg0: i32) -> (i32, i32) {
    %c0_i32 = arith.constant 0 : i32
    %c0_i32_0 = arith.constant 0 : i32
    %c0_i32_1 = arith.constant 0 : i32
    return %c0_i32, %c0_i32_0 : i32, i32
  }
  func.func @transform_9(%arg0: i32) -> (i32, i32) {
    %c0_i32 = arith.constant 0 : i32
    %c0_i32_0 = arith.constant 0 : i32
    %c0_i32_1 = arith.constant 0 : i32
    return %c0_i32, %c0_i32_0 : i32, i32
  }
  func.func @transform_10(%arg0: i32) -> (i32, i32) {
    %c0_i32 = arith.constant 0 : i32
    %c0_i32_0 = arith.constant 0 : i32
    %c0_i32_1 = arith.constant 0 : i32
    return %c0_i32, %c0_i32_0 : i32, i32
  }
  func.func @transform_11(%arg0: i32) -> (i32, i32) {
    %c0_i32 = arith.constant 0 : i32
    %c0_i32_0 = arith.constant 0 : i32
    return %c0_i32, %arg0 : i32, i32
  }
}

</mosaic_0001>

<bundles_post_ra>
// kernel: pytorch_nn_forward.1
= control target key start
LH: loop header
LB: loop body
LE: loop exit
PB: predicated region body
PF: predicated region fallthrough
CT: control target
= control target key end

     0   :  { %v1238_v0 = vmov 0   ;;  %vm209_vm0 = vcmask 261120   ;;  %s1643_s2 = inlined_call_operand.vmem [shape: f32[128,1], index: 2, kind: input, shape index: {}]   ;;  %s1644_s0 = inlined_call_operand.vmem [shape: bf16[32,128], index: 0, kind: input, shape index: {}]   ;;  %s1645_s1 = inlined_call_operand.vmem [shape: bf16[128,32], index: 1, kind: input, shape index: {}]   ;;  %s1646_s4 = inlined_call_operand.vmem [shape: f32[128,1], index: 4, kind: input, shape index: {}]   ;;  %s1647_s6 = inlined_call_operand.vmem [shape: f32[128,1], index: 6, kind: input, shape index: {}]   ;;  %s1648_s8 = inlined_call_operand.vmem [shape: f32[128,1], index: 8, kind: input, shape index: {}]   ;;  %s1649_s10 = inlined_call_operand.<no memory space> [shape: f32[1,1], index: 10, kind: input, shape index: {}]   ;;  %s1650_s3 = inlined_call_operand.vmem [shape: bf16[128,128], index: 3, kind: input, shape index: {}]   ;;  %s1651_s5 = inlined_call_operand.vmem [shape: bf16[128,128], index: 5, kind: input, shape index: {}]   ;;  %s1652_s7 = inlined_call_operand.vmem [shape: bf16[128,128], index: 7, kind: input, shape index: {}]   ;;  %s1653_s9 = inlined_call_operand.vmem [shape: bf16[1,128], index: 9, kind: input, shape index: {}]   ;;  %s1654_s11 = inlined_call_operand.vmem [shape: f32[1,128], index: 11, kind: output, shape index: {}]  }
   0x1   :  { %1233 = vset.pattern.permute.xlu2 %v1238_v0  ;;  %1232 = vset.pattern.permute.xlu1 %v1238_v0  ;;  %v75_v1 = vld [vmem:[%s1643_s2 + $0x70] sm:$0xff]  ;;  %v73_v2 = vld [vmem:[%s1643_s2 + $0x60] sm:$0xff]  ;;  %v1197_v4 = vld [vmem:[%s1644_s0 + $0x8] sm:$0xff] }
   0x2   :  { %v71_v3 = vld [vmem:[%s1643_s2 + $0x50] sm:$0xff]  ;;  %1231 = vset.pattern.permute.xlu0 %v1238_v0  ;;  %139 = vperm.xlu1 %1232, %v73_v2   ;;  %v1196_v5 = vld [vmem:[%s1644_s0] sm:$0xff]  ;;  %v74_v6 = vld [vmem:[%s1643_s2 + $0x68] sm:$0xff] }
   0x3   :  { %149 = vperm.xlu0 %1231, %v75_v1   ;;  %129 = vperm.xlu2 %1233, %v71_v3   ;;  %v76_v7 = vld [vmem:[%s1643_s2 + $0x78] sm:$0xff]  ;;  %v1198_v9 = vld [vmem:[%s1645_s1] sm:$0xff]  ;;  %v70_v10 = vld [vmem:[%s1643_s2 + $0x48] sm:$0xff] }
   0x4   :  { %240 = vmatpush.bf16.msra.mxu0 %v1197_v4  ;;  %v72_v8 = vld [vmem:[%s1643_s2 + $0x58] sm:$0xff]  ;;  %v69_v11 = vld [vmem:[%s1643_s2 + $0x40] sm:$0xff]  ;;  %v67_v12 = vld [vmem:[%s1643_s2 + $0x30] sm:$0xff]  ;;  %v16_v4 = vstv %s1649_s10 }
   0x5   :  { %v65_v13 = vld [vmem:[%s1643_s2 + $0x20] sm:$0xff]  ;;  %v68_v14 = vld [vmem:[%s1643_s2 + $0x38] sm:$0xff]  ;;  %v66_v15 = vld [vmem:[%s1643_s2 + $0x28] sm:$0xff]  ;;  %17 = vst [vmem:[#allocation2] sm:$0x1] %v16_v4 }
   0x6   :  { %v1199_v16 = vld [vmem:[%s1645_s1 + $0x8] sm:$0xff]  ;;  %v64_v17 = vld [vmem:[%s1643_s2 + $0x18] sm:$0xff]  ;;  %v63_v18 = vld [vmem:[%s1643_s2 + $0x10] sm:$0xff] }
   0x7   :  { %v61_v19 = vld [vmem:[%s1643_s2] sm:$0xff]  ;;  %v337_v20 = vld [vmem:[%s1646_s4 + $0x70] sm:$0xff]  ;;  %v62_v21 = vld [vmem:[%s1643_s2 + $0x8] sm:$0xff] }
   0x8   :  { %241 = vmatpush.bf16.msra.mxu0 %v1196_v5  ;;  %v338_v22 = vld [vmem:[%s1646_s4 + $0x78] sm:$0xff]  ;;  %v1200_v23 = vld [vmem:[%s1645_s1 + $0x10] sm:$0xff]  ;;  %v336_v24 = vld [vmem:[%s1646_s4 + $0x68] sm:$0xff] }
   0x9   :  { %v335_v25 = vld [vmem:[%s1646_s4 + $0x60] sm:$0xff]  ;;  %v333_v26 = vld [vmem:[%s1646_s4 + $0x50] sm:$0xff]  ;;  %v334_v28 = vld [vmem:[%s1646_s4 + $0x58] sm:$0xff] }
   0xa   :  { %144 = vperm.xlu1 %1232, %v74_v6   ;;  %v331_v27 = vld [vmem:[%s1646_s4 + $0x40] sm:$0xff]  ;;  %v332_v29 = vld [vmem:[%s1646_s4 + $0x48] sm:$0xff]  ;;  %v1201_v30 = vld [vmem:[%s1645_s1 + $0x18] sm:$0xff] }
   0xb   :  { %154 = vperm.xlu0 %1231, %v76_v7   ;;  %134 = vperm.xlu2 %1233, %v72_v8   ;;  %v330_v31 = vld [vmem:[%s1646_s4 + $0x38] sm:$0xff]  ;;  %v329_v32 = vld [vmem:[%s1646_s4 + $0x30] sm:$0xff]  ;;  %v327_v33 = vld [vmem:[%s1646_s4 + $0x20] sm:$0xff] }
   0xc   :  { %1091 = vmatmul.msk.bf16.vlgmr.msra.gmra.mxu0 %vm209_vm0, %v1198_v9  ;;  %v325_v34 = vld [vmem:[%s1646_s4 + $0x10] sm:$0xff]  ;;  %v328_v35 = vld [vmem:[%s1646_s4 + $0x28] sm:$0xff]  ;;  %v326_v36 = vld [vmem:[%s1646_s4 + $0x18] sm:$0xff] }
   0xd   :  { %v1202_v37 = vld [vmem:[%s1645_s1 + $0x20] sm:$0xff]  ;;  %v324_v38 = vld [vmem:[%s1646_s4 + $0x8] sm:$0xff]  ;;  %v570_v40 = vld [vmem:[%s1647_s6 + $0x70] sm:$0xff] }
   0xe   :  { %v323_v39 = vld [vmem:[%s1646_s4] sm:$0xff]  ;;  %v571_v42 = vld [vmem:[%s1647_s6 + $0x78] sm:$0xff]  ;;  %v569_v43 = vld [vmem:[%s1647_s6 + $0x68] sm:$0xff] }
   0xf   :  { %v568_v41 = vld [vmem:[%s1647_s6 + $0x60] sm:$0xff]  ;;  %v1203_v44 = vld [vmem:[%s1645_s1 + $0x28] sm:$0xff]  ;;  %v567_v45 = vld [vmem:[%s1647_s6 + $0x58] sm:$0xff] }
  0x10   :  { %v566_v46 = vld [vmem:[%s1647_s6 + $0x50] sm:$0xff]  ;;  %v564_v47 = vld [vmem:[%s1647_s6 + $0x40] sm:$0xff]  ;;  %v565_v49 = vld [vmem:[%s1647_s6 + $0x48] sm:$0xff] }
  0x11   :  { %v562_v48 = vld [vmem:[%s1647_s6 + $0x30] sm:$0xff]  ;;  %v563_v50 = vld [vmem:[%s1647_s6 + $0x38] sm:$0xff]  ;;  %v561_v52 = vld [vmem:[%s1647_s6 + $0x28] sm:$0xff] }
  0x12   :  { %124 = vperm.xlu1 %1232, %v70_v10   ;;  %v1204_v51 = vld [vmem:[%s1645_s1 + $0x30] sm:$0xff]  ;;  %v560_v53 = vld [vmem:[%s1647_s6 + $0x20] sm:$0xff]  ;;  %v559_v58 = vld [vmem:[%s1647_s6 + $0x18] sm:$0xff] }
  0x13   :  { %119 = vperm.xlu0 %1231, %v69_v11   ;;  %109 = vperm.xlu2 %1233, %v67_v12   ;;  %v558_v54 = vld [vmem:[%s1647_s6 + $0x10] sm:$0xff]  ;;  %v556_v57 = vld [vmem:[%s1647_s6] sm:$0xff]  ;;  %v557_v59 = vld [vmem:[%s1647_s6 + $0x8] sm:$0xff] }
  0x14   :  { %v1205_v60 = vld [vmem:[%s1645_s1 + $0x38] sm:$0xff]  ;;  %v803_v1 = vld [vmem:[%s1648_s8 + $0x70] sm:$0xff]  ;;  %v801_v2 = vld [vmem:[%s1648_s8 + $0x60] sm:$0xff] }
  0x15   :  { %v804_v0 = vld [vmem:[%s1648_s8 + $0x78] sm:$0xff]  ;;  %v799_v7 = vld [vmem:[%s1648_s8 + $0x50] sm:$0xff]  ;;  %v802_v8 = vld [vmem:[%s1648_s8 + $0x68] sm:$0xff] }
  0x16   :  { %v800_v9 = vld [vmem:[%s1648_s8 + $0x58] sm:$0xff] }
  0x1a   :  { %99 = vperm.xlu1 %1232, %v65_v13   ;;  %v798_v13 = vld [vmem:[%s1648_s8 + $0x48] sm:$0xff] }
  0x1b   :  { %114 = vperm.xlu0 %1231, %v68_v14   ;;  %104 = vperm.xlu2 %1233, %v66_v15   ;;  %v797_v14 = vld [vmem:[%s1648_s8 + $0x40] sm:$0xff]  ;;  %v795_v15 = vld [vmem:[%s1648_s8 + $0x30] sm:$0xff] }
  0x1c   :  { %1092 = vmatmul.msk.bf16.gmra.mxu0 %vm209_vm0, %v1199_v16 }
  0x22   :  { %94 = vperm.xlu1 %1232, %v64_v17  }
  0x23   :  { %89 = vperm.xlu0 %1231, %v63_v18   ;;  %79 = vperm.xlu2 %1233, %v61_v19  }
  0x2a   :  { %411 = vperm.xlu1 %1232, %v337_v20   ;;  %v793_v20 = vld [vmem:[%s1648_s8 + $0x20] sm:$0xff] }
  0x2b   :  { %84 = vperm.xlu0 %1231, %v62_v21   ;;  %416 = vperm.xlu2 %1233, %v338_v22   ;;  %v796_v21 = vld [vmem:[%s1648_s8 + $0x38] sm:$0xff]  ;;  %v794_v22 = vld [vmem:[%s1648_s8 + $0x28] sm:$0xff] }
  0x2c   :  { %1093 = vmatmul.msk.bf16.gmra.mxu0 %vm209_vm0, %v1200_v23 }
  0x32   :  { %406 = vperm.xlu1 %1232, %v336_v24  }
  0x33   :  { %401 = vperm.xlu0 %1231, %v335_v25   ;;  %391 = vperm.xlu2 %1233, %v333_v26  }
  0x3a   :  { %381 = vperm.xlu1 %1232, %v331_v27  }
  0x3b   :  { %396 = vperm.xlu0 %1231, %v334_v28   ;;  %386 = vperm.xlu2 %1233, %v332_v29   ;;  %v792_v28 = vld [vmem:[%s1648_s8 + $0x18] sm:$0xff] }
  0x3c   :  { %1094 = vmatmul.msk.bf16.gmra.mxu0 %vm209_vm0, %v1201_v30 }
  0x42   :  { %376 = vperm.xlu1 %1232, %v330_v31  }
  0x43   :  { %371 = vperm.xlu0 %1231, %v329_v32   ;;  %361 = vperm.xlu2 %1233, %v327_v33   ;;  %v791_v32 = vld [vmem:[%s1648_s8 + $0x10] sm:$0xff]  ;;  %v789_v33 = vld [vmem:[%s1648_s8] sm:$0xff] }
  0x4a   :  { %351 = vperm.xlu1 %1232, %v325_v34  }
  0x4b   :  { %366 = vperm.xlu0 %1231, %v328_v35   ;;  %356 = vperm.xlu2 %1233, %v326_v36  }
  0x4c   :  { %1095 = vmatmul.msk.bf16.gmra.mxu0 %vm209_vm0, %v1202_v37 }
  0x52   :  { %346 = vperm.xlu1 %1232, %v324_v38  }
  0x53   :  { %341 = vperm.xlu0 %1231, %v323_v39   ;;  %644 = vperm.xlu2 %1233, %v570_v40  }
  0x5a   :  { %634 = vperm.xlu1 %1232, %v568_v41   ;;  %v1007_v41 = vld [vmem:[#allocation2] sm:$0x1] }
  0x5b   :  { %649 = vperm.xlu0 %1231, %v571_v42   ;;  %639 = vperm.xlu2 %1233, %v569_v43   ;;  %v790_v42 = vld [vmem:[%s1648_s8 + $0x8] sm:$0xff] }
  0x5c   :  { %1096 = vmatmul.msk.bf16.gmra.mxu0 %vm209_vm0, %v1203_v44 }
  0x5d   :  { %v1468_v55 = vpop.permute.xlu2 %129 }
  0x62   :  { %629 = vperm.xlu1 %1232, %v567_v45  }
  0x63   :  { %624 = vperm.xlu0 %1231, %v566_v46   ;;  %614 = vperm.xlu2 %1233, %v564_v47  }
  0x65   :  { %v1487_v62 = vpop.permute.xlu2 %134 }
  0x6a   :  { %604 = vperm.xlu1 %1232, %v562_v48  }
  0x6b   :  { %619 = vperm.xlu0 %1231, %v565_v49   ;;  %609 = vperm.xlu2 %1233, %v563_v50  }
  0x6c   :  { %1097 = vmatmul.msk.bf16.gmra.mxu0 %vm209_vm0, %v1204_v51 }
  0x6d   :  { %v110_v6 = vpop.permute.xlu2 %109 }
  0x72   :  { %599 = vperm.xlu1 %1232, %v561_v52  }
  0x73   :  { %594 = vperm.xlu0 %1231, %v560_v53   ;;  %584 = vperm.xlu2 %1233, %v558_v54  }
  0x74   :  { %v1484_v61 = vpop.permute.xlu1 %139 }
  0x75   :  { %v1470_v56 = vpop.permute.xlu0 %149  ;;  %v105_v16 = vpop.permute.xlu2 %104 }
  0x7a   :  { %574 = vperm.xlu1 %1232, %v556_v57  }
  0x7b   :  { %589 = vperm.xlu0 %1231, %v559_v58   ;;  %579 = vperm.xlu2 %1233, %v557_v59  }
  0x7c   :  { %1098 = vmatmul.msk.bf16.gmra.mxu0 %vm209_vm0, %v1205_v60  ;;  %v1500_v3 = vpop.permute.xlu1 %144 }
  0x7d   :  { %v1489_v63 = vpop.permute.xlu0 %154  ;;  %v80_v24 = vpop.permute.xlu2 %79 }
  0x82   :  { %882 = vperm.xlu1 %1232, %v804_v0  }
  0x83   :  { %877 = vperm.xlu0 %1231, %v803_v1   ;;  %867 = vperm.xlu2 %1233, %v801_v2  }
  0x84   :  { %v1516_v11 = vpop.permute.xlu1 %124 }
  0x85   :  { %v1505_v5 = vpop.permute.xlu0 %119 }
  0x89   :  { %v243_v10 = vpop.f32.mrf.mxu0 }
  0x8a   :  { %857 = vperm.xlu1 %1232, %v799_v7   ;;  %v244_v25 = vadd.f32 %v243_v10, %v80_v24 }
  0x8b   :  { %872 = vperm.xlu0 %1231, %v802_v8   ;;  %862 = vperm.xlu2 %1233, %v800_v9  }
  0x8c   :  { %v100_v19 = vpop.permute.xlu1 %99  ;;  %v283_v29 = vmax.f32 %v244_v25, 0.0  ;;  %v1210_v25 = vld [vmem:[%s1650_s3 + $0x20] sm:$0xff] }
  0x8d   :  { %v115_v12 = vpop.permute.xlu0 %114 }
  0x91   :  { %v245_v17 = vpop.f32.mrf.mxu0 }
  0x92   :  { %852 = vperm.xlu1 %1232, %v798_v13  }
  0x93   :  { %847 = vperm.xlu0 %1231, %v797_v14   ;;  %837 = vperm.xlu2 %1233, %v795_v15  }
  0x94   :  { %v95_v34 = vpop.permute.xlu1 %94 }
  0x95   :  { %v90_v18 = vpop.permute.xlu0 %89 }
  0x99   :  { %v248_v23 = vpop.f32.mrf.mxu0 }
  0x9a   :  { %827 = vperm.xlu1 %1232, %v793_v20   ;;  %v249_v30 = vadd.f32 %v248_v23, %v90_v18 }
  0x9b   :  { %842 = vperm.xlu0 %1231, %v796_v21   ;;  %832 = vperm.xlu2 %1233, %v794_v22  }
  0x9c   :  { %v285_v38 = vmax.f32 %v249_v30, 0.0 }
  0x9d   :  { %v85_v26 = vpop.permute.xlu0 %84 }
  0x9e   :  { %v246_v27 = vadd.f32 %v245_v17, %v85_v26  ;;  %v1211_v26 = vld [vmem:[%s1650_s3 + $0x28] sm:$0xff] }
  0xa0   :  { %v284_v31 = vmax.f32 %v246_v27, 0.0  ;;  %v412_v27 = vpop.permute.xlu1 %411 }
  0xa1   :  { %v250_v35 = vpop.f32.mrf.mxu0 }
  0xa2   :  { %v251_v36 = vadd.f32 %v250_v35, %v95_v34  ;;  %822 = vperm.xlu1 %1232, %v792_v28   ;;  %v299_v37 = vpack.c.bf16 %v284_v31, %v283_v29  ;;  %v1212_v29 = vld [vmem:[%s1650_s3 + $0x30] sm:$0xff]  ;;  %v417_v34 = vpop.permute.xlu2 %416 }
  0xa3   :  { %817 = vperm.xlu0 %1231, %v791_v32   ;;  %807 = vperm.xlu2 %1233, %v789_v33   ;;  %v1213_v33 = vld [vmem:[%s1650_s3 + $0x38] sm:$0xff] }
  0xa4   :  { %v286_v39 = vmax.f32 %v251_v36, 0.0 }
  0xa5   :  { %v402_v28 = vpop.permute.xlu0 %401 }
  0xa6   :  { %v300_v40 = vpack.c.bf16 %v286_v39, %v285_v38 }
  0xa8   :  { %v407_v30 = vpop.permute.xlu1 %406 }
  0xa9   :  { %v253_v43 = vpop.f32.mrf.mxu0 }
  0xaa   :  { %1010 = vperm.xlu1 %1232, %v1007_v41   ;;  %v254_v44 = vadd.f32 %v253_v43, %v100_v19 }
  0xab   :  { %812 = vperm.xlu0 %1231, %v790_v42  }
  0xac   :  { %v287_v47 = vmax.f32 %v254_v44, 0.0 }
  0xad   :  { %v397_v31 = vpop.permute.xlu0 %396 }
  0xb0   :  { %v1577_v32 = vpop.permute.xlu1 %381 }
  0xb1   :  { %v255_v45 = vpop.f32.mrf.mxu0 }
  0xb2   :  { %v256_v46 = vadd.f32 %v255_v45, %v105_v16 }
  0xb4   :  { %v288_v48 = vmax.f32 %v256_v46, 0.0 }
  0xb5   :  { %v372_v35 = vpop.permute.xlu0 %371 }
  0xb6   :  { %v301_v49 = vpack.c.bf16 %v288_v48, %v287_v47 }
  0xb8   :  { %v377_v36 = vpop.permute.xlu1 %376 }
  0xb9   :  { %v258_v50 = vpop.f32.mrf.mxu0 }
  0xba   :  { %v259_v51 = vadd.f32 %v258_v50, %v110_v6 }
  0xbc   :  { %v289_v54 = vmax.f32 %v259_v51, 0.0 }
  0xbd   :  { %v367_v38 = vpop.permute.xlu0 %366 }
  0xc0   :  { %v352_v39 = vpop.permute.xlu1 %351 }
  0xc1   :  { %v260_v52 = vpop.f32.mrf.mxu0 }
  0xc2   :  { %v261_v53 = vadd.f32 %v260_v52, %v115_v12 }
  0xc4   :  { %v290_v57 = vmax.f32 %v261_v53, 0.0 }
  0xc5   :  { %v342_v42 = vpop.permute.xlu0 %341 }
  0xc6   :  { %v302_v58 = vpack.c.bf16 %v290_v57, %v289_v54 }
  0xc8   :  { %v347_v44 = vpop.permute.xlu1 %346 }
  0xc9   :  { %v263_v59 = vpop.f32.mrf.mxu0 }
  0xd1   :  { %v265_v60 = vpop.f32.mrf.mxu0 }
  0xd2   :  { %v266_v20 = vadd.f32 %v265_v60, %v1516_v11  ;;  %v1209_v11 = vld [vmem:[%s1650_s3 + $0x18] sm:$0xff] }
  0xd9   :  { %v268_v0 = vpop.f32.mrf.mxu0 }
  0xda   :  { %v269_v18 = vadd.f32 %v268_v0, %v1468_v55  ;;  %v1206_v55 = vld [vmem:[%s1650_s3] sm:$0xff] }
  0xdc   :  { %v293_v22 = vmax.f32 %v269_v18, 0.0 }
  0xe1   :  { %v270_v1 = vpop.f32.mrf.mxu0 }
  0xe2   :  { %v271_v15 = vadd.f32 %v270_v1, %v1487_v62  ;;  %v1207_v62 = vld [vmem:[%s1650_s3 + $0x8] sm:$0xff] }
  0xe9   :  { %v273_v2 = vpop.f32.mrf.mxu0 }
  0xea   :  { %v274_v6 = vadd.f32 %v273_v2, %v1484_v61 }
  0xec   :  { %v295_v19 = vmax.f32 %v274_v6, 0.0 }
  0xf1   :  { %v275_v4 = vpop.f32.mrf.mxu0 }
  0xf2   :  { %v276_v10 = vadd.f32 %v275_v4, %v1500_v3  ;;  %v264_v3 = vadd.f32 %v263_v59, %v1505_v5  ;;  %v1208_v5 = vld [vmem:[%s1650_s3 + $0x10] sm:$0xff] }
  0xf4   :  { %v296_v16 = vmax.f32 %v276_v10, 0.0  ;;  %v291_v23 = vmax.f32 %v264_v3, 0.0 }
  0xf6   :  { %v305_v21 = vpack.c.bf16 %v296_v16, %v295_v19 }
  0xf9   :  { %v278_v7 = vpop.f32.mrf.mxu0 }
  0xfa   :  { %v279_v8 = vadd.f32 %v278_v7, %v1470_v56  ;;  %v294_v56 = vmax.f32 %v271_v15, 0.0 }
  0xfc   :  { %v297_v12 = vmax.f32 %v279_v8, 0.0  ;;  %v304_v61 = vpack.c.bf16 %v294_v56, %v293_v22 }
 0x101   :  { %v280_v9 = vpop.f32.mrf.mxu0 }
 0x102   :  { %v281_v13 = vadd.f32 %v280_v9, %v1489_v63  ;;  %v292_v63 = vmax.f32 %v266_v20, 0.0 }
 0x104   :  { %v298_v14 = vmax.f32 %v281_v13, 0.0  ;;  %v303_v24 = vpack.c.bf16 %v292_v63, %v291_v23 }
 0x106   :  { %v306_v17 = vpack.c.bf16 %v298_v14, %v297_v12 }
 0x108   :  { %467 = vmatpush.bf16.msra.mxu1 %v306_v17 }
 0x10c   :  { %468 = vmatpush.bf16.msra.mxu1 %v305_v21 }
 0x110   :  { %469 = vmatpush.bf16.msra.mxu1 %v304_v61 }
 0x114   :  { %470 = vmatpush.bf16.msra.mxu1 %v303_v24 }
 0x118   :  { %471 = vmatpush.bf16.msra.mxu1 %v302_v58 }
 0x11c   :  { %472 = vmatpush.bf16.msra.mxu1 %v301_v49 }
 0x120   :  { %473 = vmatpush.bf16.msra.mxu1 %v300_v40 }
 0x124   :  { %474 = vmatpush.bf16.msra.mxu1 %v299_v37  ;;  %v392_v37 = vpop.permute.xlu2 %391 }
 0x127   :  { %475 = vmatmul.bf16.vlgmr.msra.gmra.mxu1 %v1206_v55 }
 0x12c   :  { %v387_v41 = vpop.permute.xlu2 %386 }
 0x134   :  { %v362_v50 = vpop.permute.xlu2 %361 }
 0x137   :  { %480 = vmatmul.bf16.gmra.mxu1 %v1207_v62 }
 0x13c   :  { %v357_v53 = vpop.permute.xlu2 %356 }
 0x147   :  { %485 = vmatmul.bf16.gmra.mxu1 %v1208_v5 }
 0x157   :  { %490 = vmatmul.bf16.gmra.mxu1 %v1209_v11 }
 0x167   :  { %495 = vmatmul.bf16.gmra.mxu1 %v1210_v25 }
 0x177   :  { %500 = vmatmul.bf16.gmra.mxu1 %v1211_v26 }
 0x187   :  { %505 = vmatmul.bf16.gmra.mxu1 %v1212_v29 }
 0x197   :  { %510 = vmatmul.bf16.gmra.mxu1 %v1213_v33 }
 0x1a4   :  { %v476_v40 = vpop.f32.mrf.mxu1 }
 0x1a5   :  { %v477_v43 = vadd.f32 %v476_v40, %v342_v42  ;;  %v1219_v42 = vld [vmem:[%s1651_s5 + $0x28] sm:$0xff] }
 0x1a7   :  { %v516_v47 = vmax.f32 %v477_v43, 0.0  ;;  %v645_v43 = vpop.permute.xlu2 %644 }
 0x1ac   :  { %v478_v45 = vpop.f32.mrf.mxu1 }
 0x1ad   :  { %v479_v46 = vadd.f32 %v478_v45, %v347_v44  ;;  %v1220_v44 = vld [vmem:[%s1651_s5 + $0x30] sm:$0xff]  ;;  %v635_v45 = vpop.permute.xlu1 %634 }
 0x1af   :  { %v517_v48 = vmax.f32 %v479_v46, 0.0  ;;  %v640_v46 = vpop.permute.xlu2 %639 }
 0x1b1   :  { %v532_v49 = vpack.c.bf16 %v517_v48, %v516_v47  ;;  %v1221_v48 = vld [vmem:[%s1651_s5 + $0x38] sm:$0xff] }
 0x1b4   :  { %v481_v51 = vpop.f32.mrf.mxu1 }
 0x1b5   :  { %v482_v52 = vadd.f32 %v481_v51, %v352_v39  ;;  %v630_v47 = vpop.permute.xlu1 %629 }
 0x1b7   :  { %v518_v58 = vmax.f32 %v482_v52, 0.0 }
 0x1bc   :  { %v483_v54 = vpop.f32.mrf.mxu1 }
 0x1bd   :  { %v484_v57 = vadd.f32 %v483_v54, %v357_v53  ;;  %v605_v51 = vpop.permute.xlu1 %604 }
 0x1bf   :  { %v519_v59 = vmax.f32 %v484_v57, 0.0 }
 0x1c1   :  { %v533_v60 = vpack.c.bf16 %v519_v59, %v518_v58 }
 0x1c4   :  { %v486_v0 = vpop.f32.mrf.mxu1 }
 0x1c5   :  { %v487_v1 = vadd.f32 %v486_v0, %v362_v50  ;;  %v650_v50 = vpop.permute.xlu0 %649  ;;  %v600_v54 = vpop.permute.xlu1 %599 }
 0x1c7   :  { %v520_v7 = vmax.f32 %v487_v1, 0.0 }
 0x1cc   :  { %v488_v2 = vpop.f32.mrf.mxu1 }
 0x1cd   :  { %v489_v4 = vadd.f32 %v488_v2, %v367_v38  ;;  %v625_v53 = vpop.permute.xlu0 %624 }
 0x1cf   :  { %v521_v8 = vmax.f32 %v489_v4, 0.0 }
 0x1d1   :  { %v534_v9 = vpack.c.bf16 %v521_v8, %v520_v7 }
 0x1d4   :  { %v491_v10 = vpop.f32.mrf.mxu1 }
 0x1d5   :  { %v492_v13 = vadd.f32 %v491_v10, %v372_v35  ;;  %v620_v59 = vpop.permute.xlu0 %619 }
 0x1d7   :  { %v522_v14 = vmax.f32 %v492_v13, 0.0 }
 0x1dc   :  { %v493_v6 = vpop.f32.mrf.mxu1 }
 0x1dd   :  { %v494_v12 = vadd.f32 %v493_v6, %v377_v36  ;;  %v595_v10 = vpop.permute.xlu0 %594 }
 0x1df   :  { %v523_v15 = vmax.f32 %v494_v12, 0.0 }
 0x1e1   :  { %v535_v16 = vpack.c.bf16 %v523_v15, %v522_v14 }
 0x1e4   :  { %v496_v17 = vpop.f32.mrf.mxu1 }
 0x1e5   :  { %v497_v38 = vadd.f32 %v496_v17, %v1577_v32  ;;  %v1215_v32 = vld [vmem:[%s1651_s5 + $0x8] sm:$0xff]  ;;  %v590_v12 = vpop.permute.xlu0 %589 }
 0x1ec   :  { %v498_v18 = vpop.f32.mrf.mxu1 }
 0x1ed   :  { %v499_v33 = vadd.f32 %v498_v18, %v387_v41  ;;  %v1218_v41 = vld [vmem:[%s1651_s5 + $0x20] sm:$0xff] }
 0x1f4   :  { %v501_v19 = vpop.f32.mrf.mxu1 }
 0x1f5   :  { %v502_v26 = vadd.f32 %v501_v19, %v392_v37  ;;  %v1217_v37 = vld [vmem:[%s1651_s5 + $0x18] sm:$0xff] }
 0x1f7   :  { %v526_v39 = vmax.f32 %v502_v26, 0.0 }
 0x1fc   :  { %v503_v20 = vpop.f32.mrf.mxu1 }
 0x1fd   :  { %v504_v5 = vadd.f32 %v503_v20, %v397_v31  ;;  %v1214_v31 = vld [vmem:[%s1651_s5] sm:$0xff] }
 0x1ff   :  { %v527_v35 = vmax.f32 %v504_v5, 0.0 }
 0x201   :  { %v537_v40 = vpack.c.bf16 %v527_v35, %v526_v39 }
 0x204   :  { %v506_v56 = vpop.f32.mrf.mxu1 }
 0x205   :  { %v507_v24 = vadd.f32 %v506_v56, %v402_v28 }
 0x207   :  { %v528_v29 = vmax.f32 %v507_v24, 0.0 }
 0x20c   :  { %v508_v21 = vpop.f32.mrf.mxu1 }
 0x20d   :  { %v509_v61 = vadd.f32 %v508_v21, %v407_v30  ;;  %v524_v30 = vmax.f32 %v497_v38, 0.0 }
 0x20f   :  { %v529_v11 = vmax.f32 %v509_v61, 0.0 }
 0x211   :  { %v538_v36 = vpack.c.bf16 %v529_v11, %v528_v29 }
 0x214   :  { %v511_v3 = vpop.f32.mrf.mxu1 }
 0x215   :  { %v512_v22 = vadd.f32 %v511_v3, %v412_v27  ;;  %v525_v27 = vmax.f32 %v499_v33, 0.0 }
 0x217   :  { %v530_v55 = vmax.f32 %v512_v22, 0.0  ;;  %v536_v28 = vpack.c.bf16 %v525_v27, %v524_v30 }
 0x21c   :  { %v513_v63 = vpop.f32.mrf.mxu1 }
 0x21d   :  { %v514_v23 = vadd.f32 %v513_v63, %v417_v34  ;;  %v1216_v34 = vld [vmem:[%s1651_s5 + $0x10] sm:$0xff] }
 0x21f   :  { %v531_v62 = vmax.f32 %v514_v23, 0.0 }
 0x221   :  { %v539_v25 = vpack.c.bf16 %v531_v62, %v530_v55 }
 0x223   :  { %700 = vmatpush.bf16.msra.mxu2 %v539_v25 }
 0x227   :  { %701 = vmatpush.bf16.msra.mxu2 %v538_v36 }
 0x22b   :  { %702 = vmatpush.bf16.msra.mxu2 %v537_v40 }
 0x22f   :  { %703 = vmatpush.bf16.msra.mxu2 %v536_v28 }
 0x233   :  { %704 = vmatpush.bf16.msra.mxu2 %v535_v16 }
 0x237   :  { %705 = vmatpush.bf16.msra.mxu2 %v534_v9 }
 0x23b   :  { %706 = vmatpush.bf16.msra.mxu2 %v533_v60  ;;  %v575_v60 = vpop.permute.xlu1 %574 }
 0x23f   :  { %707 = vmatpush.bf16.msra.mxu2 %v532_v49  ;;  %v1607_v49 = vpop.permute.xlu2 %614 }
 0x242   :  { %708 = vmatmul.bf16.vlgmr.msra.gmra.mxu2 %v1214_v31 }
 0x247   :  { %v610_v52 = vpop.permute.xlu2 %609 }
 0x24f   :  { %v585_v57 = vpop.permute.xlu2 %584 }
 0x252   :  { %713 = vmatmul.bf16.gmra.mxu2 %v1215_v32 }
 0x257   :  { %v580_v1 = vpop.permute.xlu2 %579 }
 0x262   :  { %718 = vmatmul.bf16.gmra.mxu2 %v1216_v34 }
 0x272   :  { %723 = vmatmul.bf16.gmra.mxu2 %v1217_v37 }
 0x282   :  { %728 = vmatmul.bf16.gmra.mxu2 %v1218_v41 }
 0x292   :  { %733 = vmatmul.bf16.gmra.mxu2 %v1219_v42 }
 0x2a2   :  { %738 = vmatmul.bf16.gmra.mxu2 %v1220_v44 }
 0x2b2   :  { %743 = vmatmul.bf16.gmra.mxu2 %v1221_v48 }
 0x2c5   :  { %v709_v58 = vpop.f32.mrf.mxu2 }
 0x2c6   :  { %v710_v0 = vadd.f32 %v709_v58, %v575_v60  ;;  %v1227_v60 = vld [vmem:[%s1652_s7 + $0x28] sm:$0xff] }
 0x2c8   :  { %v749_v7 = vmax.f32 %v710_v0, 0.0  ;;  %v878_v0 = vpop.permute.xlu0 %877 }
 0x2cd   :  { %v711_v2 = vpop.f32.mrf.mxu2 }
 0x2ce   :  { %v712_v4 = vadd.f32 %v711_v2, %v580_v1  ;;  %v1228_v1 = vld [vmem:[%s1652_s7 + $0x30] sm:$0xff]  ;;  %v868_v2 = vpop.permute.xlu2 %867 }
 0x2d0   :  { %v750_v8 = vmax.f32 %v712_v4, 0.0  ;;  %v873_v4 = vpop.permute.xlu0 %872 }
 0x2d2   :  { %v765_v9 = vpack.c.bf16 %v750_v8, %v749_v7  ;;  %v1229_v8 = vld [vmem:[%s1652_s7 + $0x38] sm:$0xff] }
 0x2d5   :  { %v714_v13 = vpop.f32.mrf.mxu2 }
 0x2d6   :  { %v715_v6 = vadd.f32 %v714_v13, %v585_v57  ;;  %v863_v7 = vpop.permute.xlu2 %862 }
 0x2d8   :  { %v751_v16 = vmax.f32 %v715_v6, 0.0 }
 0x2dd   :  { %v716_v14 = vpop.f32.mrf.mxu2 }
 0x2de   :  { %v717_v15 = vadd.f32 %v716_v14, %v590_v12  ;;  %v838_v13 = vpop.permute.xlu2 %837 }
 0x2e0   :  { %v752_v17 = vmax.f32 %v717_v15, 0.0 }
 0x2e2   :  { %v766_v18 = vpack.c.bf16 %v752_v17, %v751_v16 }
 0x2e5   :  { %v719_v19 = vpop.f32.mrf.mxu2 }
 0x2e6   :  { %v720_v20 = vadd.f32 %v719_v19, %v595_v10  ;;  %v883_v10 = vpop.permute.xlu1 %882  ;;  %v833_v14 = vpop.permute.xlu2 %832 }
 0x2e8   :  { %v753_v3 = vmax.f32 %v720_v20, 0.0 }
 0x2ed   :  { %v721_v56 = vpop.f32.mrf.mxu2 }
 0x2ee   :  { %v722_v21 = vadd.f32 %v721_v56, %v600_v54  ;;  %v858_v12 = vpop.permute.xlu1 %857 }
 0x2f0   :  { %v754_v22 = vmax.f32 %v722_v21, 0.0 }
 0x2f2   :  { %v767_v63 = vpack.c.bf16 %v754_v22, %v753_v3 }
 0x2f5   :  { %v724_v61 = vpop.f32.mrf.mxu2 }
 0x2f6   :  { %v725_v23 = vadd.f32 %v724_v61, %v605_v51  ;;  %v853_v17 = vpop.permute.xlu1 %852 }
 0x2f8   :  { %v755_v62 = vmax.f32 %v725_v23, 0.0 }
 0x2fd   :  { %v726_v24 = vpop.f32.mrf.mxu2 }
 0x2fe   :  { %v727_v55 = vadd.f32 %v726_v24, %v610_v52  ;;  %v828_v61 = vpop.permute.xlu1 %827 }
 0x300   :  { %v756_v5 = vmax.f32 %v727_v55, 0.0 }
 0x302   :  { %v768_v11 = vpack.c.bf16 %v756_v5, %v755_v62 }
 0x305   :  { %v729_v25 = vpop.f32.mrf.mxu2 }
 0x306   :  { %v730_v54 = vadd.f32 %v729_v25, %v1607_v49  ;;  %v1223_v49 = vld [vmem:[%s1652_s7 + $0x8] sm:$0xff]  ;;  %v823_v55 = vpop.permute.xlu1 %822 }
 0x30d   :  { %v731_v26 = vpop.f32.mrf.mxu2 }
 0x30e   :  { %v732_v48 = vadd.f32 %v731_v26, %v620_v59  ;;  %v1226_v59 = vld [vmem:[%s1652_s7 + $0x20] sm:$0xff] }
 0x315   :  { %v734_v29 = vpop.f32.mrf.mxu2 }
 0x316   :  { %v735_v42 = vadd.f32 %v734_v29, %v625_v53  ;;  %v1225_v53 = vld [vmem:[%s1652_s7 + $0x18] sm:$0xff] }
 0x318   :  { %v759_v57 = vmax.f32 %v735_v42, 0.0 }
 0x31d   :  { %v736_v33 = vpop.f32.mrf.mxu2 }
 0x31e   :  { %v737_v34 = vadd.f32 %v736_v33, %v630_v47  ;;  %v1222_v47 = vld [vmem:[%s1652_s7] sm:$0xff] }
 0x320   :  { %v760_v51 = vmax.f32 %v737_v34, 0.0 }
 0x322   :  { %v770_v58 = vpack.c.bf16 %v760_v51, %v759_v57 }
 0x325   :  { %v739_v35 = vpop.f32.mrf.mxu2 }
 0x326   :  { %v740_v28 = vadd.f32 %v739_v35, %v635_v45 }
 0x328   :  { %v761_v44 = vmax.f32 %v740_v28, 0.0 }
 0x32d   :  { %v741_v36 = vpop.f32.mrf.mxu2 }
 0x32e   :  { %v742_v40 = vadd.f32 %v741_v36, %v640_v46  ;;  %v757_v46 = vmax.f32 %v730_v54, 0.0 }
 0x330   :  { %v762_v37 = vmax.f32 %v742_v40, 0.0 }
 0x332   :  { %v771_v52 = vpack.c.bf16 %v762_v37, %v761_v44 }
 0x335   :  { %v744_v38 = vpop.f32.mrf.mxu2 }
 0x336   :  { %v745_v39 = vadd.f32 %v744_v38, %v645_v43  ;;  %v758_v43 = vmax.f32 %v732_v48, 0.0 }
 0x338   :  { %v763_v31 = vmax.f32 %v745_v39, 0.0  ;;  %v769_v45 = vpack.c.bf16 %v758_v43, %v757_v46 }
 0x33d   :  { %v746_v27 = vpop.f32.mrf.mxu2 }
 0x33e   :  { %v747_v30 = vadd.f32 %v746_v27, %v650_v50  ;;  %v1224_v50 = vld [vmem:[%s1652_s7 + $0x10] sm:$0xff] }
 0x340   :  { %v764_v32 = vmax.f32 %v747_v30, 0.0 }
 0x342   :  { %v772_v41 = vpack.c.bf16 %v764_v32, %v763_v31 }
 0x344   :  { %933 = vmatpush.bf16.msra.mxu3 %v772_v41 }
 0x348   :  { %934 = vmatpush.bf16.msra.mxu3 %v771_v52 }
 0x34c   :  { %935 = vmatpush.bf16.msra.mxu3 %v770_v58 }
 0x350   :  { %936 = vmatpush.bf16.msra.mxu3 %v769_v45 }
 0x354   :  { %937 = vmatpush.bf16.msra.mxu3 %v768_v11 }
 0x358   :  { %938 = vmatpush.bf16.msra.mxu3 %v767_v63 }
 0x35c   :  { %939 = vmatpush.bf16.msra.mxu3 %v766_v18  ;;  %v808_v18 = vpop.permute.xlu2 %807 }
 0x360   :  { %940 = vmatpush.bf16.msra.mxu3 %v765_v9  ;;  %v1634_v9 = vpop.permute.xlu0 %847 }
 0x363   :  { %941 = vmatmul.bf16.vlgmr.msra.gmra.mxu3 %v1222_v47 }
 0x368   :  { %v843_v6 = vpop.permute.xlu0 %842 }
 0x370   :  { %v818_v15 = vpop.permute.xlu0 %817 }
 0x373   :  { %946 = vmatmul.bf16.gmra.mxu3 %v1223_v49 }
 0x378   :  { %v813_v20 = vpop.permute.xlu0 %812 }
 0x383   :  { %951 = vmatmul.bf16.gmra.mxu3 %v1224_v50 }
 0x393   :  { %956 = vmatmul.bf16.gmra.mxu3 %v1225_v53 }
 0x3a3   :  { %961 = vmatmul.bf16.gmra.mxu3 %v1226_v59 }
 0x3b3   :  { %966 = vmatmul.bf16.gmra.mxu3 %v1227_v60 }
 0x3c3   :  { %971 = vmatmul.bf16.gmra.mxu3 %v1228_v1 }
 0x3d3   :  { %976 = vmatmul.bf16.gmra.mxu3 %v1229_v8 }
 0x3e6   :  { %v942_v16 = vpop.f32.mrf.mxu3 }
 0x3e7   :  { %v943_v19 = vadd.f32 %v942_v16, %v808_v18 }
 0x3e9   :  { %v982_v3 = vmax.f32 %v943_v19, 0.0 }
 0x3ee   :  { %v944_v56 = vpop.f32.mrf.mxu3 }
 0x3ef   :  { %v945_v21 = vadd.f32 %v944_v56, %v813_v20 }
 0x3f1   :  { %v983_v22 = vmax.f32 %v945_v21, 0.0 }
 0x3f3   :  { %v998_v63 = vpack.c.bf16 %v983_v22, %v982_v3 }
 0x3f6   :  { %v947_v23 = vpop.f32.mrf.mxu3 }
 0x3f7   :  { %v948_v24 = vadd.f32 %v947_v23, %v818_v15 }
 0x3f9   :  { %v984_v11 = vmax.f32 %v948_v24, 0.0 }
 0x3fe   :  { %v949_v62 = vpop.f32.mrf.mxu3 }
 0x3ff   :  { %v950_v5 = vadd.f32 %v949_v62, %v823_v55 }
 0x401   :  { %v985_v25 = vmax.f32 %v950_v5, 0.0 }
 0x403   :  { %v999_v26 = vpack.c.bf16 %v985_v25, %v984_v11 }
 0x406   :  { %v952_v29 = vpop.f32.mrf.mxu3 }
 0x407   :  { %v953_v33 = vadd.f32 %v952_v29, %v828_v61 }
 0x409   :  { %v986_v38 = vmax.f32 %v953_v33, 0.0 }
 0x40e   :  { %v954_v35 = vpop.f32.mrf.mxu3 }
 0x40f   :  { %v955_v36 = vadd.f32 %v954_v35, %v833_v14 }
 0x411   :  { %v987_v39 = vmax.f32 %v955_v36, 0.0 }
 0x413   :  { %v1000_v27 = vpack.c.bf16 %v987_v39, %v986_v38 }
 0x416   :  { %v957_v40 = vpop.f32.mrf.mxu3 }
 0x417   :  { %v958_v30 = vadd.f32 %v957_v40, %v838_v13 }
 0x419   :  { %v988_v32 = vmax.f32 %v958_v30, 0.0 }
 0x41e   :  { %v959_v28 = vpop.f32.mrf.mxu3 }
 0x41f   :  { %v960_v31 = vadd.f32 %v959_v28, %v843_v6 }
 0x421   :  { %v989_v34 = vmax.f32 %v960_v31, 0.0 }
 0x423   :  { %v1001_v37 = vpack.c.bf16 %v989_v34, %v988_v32 }
 0x426   :  { %v962_v41 = vpop.f32.mrf.mxu3 }
 0x427   :  { %v963_v14 = vadd.f32 %v962_v41, %v1634_v9 }
 0x42e   :  { %v964_v42 = vpop.f32.mrf.mxu3 }
 0x42f   :  { %v965_v8 = vadd.f32 %v964_v42, %v853_v17 }
 0x436   :  { %v967_v44 = vpop.f32.mrf.mxu3 }
 0x437   :  { %v968_v60 = vadd.f32 %v967_v44, %v858_v12 }
 0x439   :  { %v992_v15 = vmax.f32 %v968_v60, 0.0 }
 0x43e   :  { %v969_v48 = vpop.f32.mrf.mxu3 }
 0x43f   :  { %v970_v50 = vadd.f32 %v969_v48, %v863_v7  ;;  %v1006_v7 = vld [vmem:[%s1653_s9] sm:$0x1] }
 0x441   :  { %v993_v13 = vmax.f32 %v970_v50, 0.0 }
 0x443   :  { %v1003_v16 = vpack.c.bf16 %v993_v13, %v992_v15 }
 0x446   :  { %v972_v51 = vpop.f32.mrf.mxu3 }
 0x447   :  { %v973_v45 = vadd.f32 %v972_v51, %v868_v2 }
 0x449   :  { %v994_v1 = vmax.f32 %v973_v45, 0.0 }
 0x44e   :  { %v974_v52 = vpop.f32.mrf.mxu3 }
 0x44f   :  { %v975_v58 = vadd.f32 %v974_v52, %v873_v4  ;;  %v990_v4 = vmax.f32 %v963_v14, 0.0 }
 0x451   :  { %v995_v53 = vmax.f32 %v975_v58, 0.0 }
 0x453   :  { %v1004_v6 = vpack.c.bf16 %v995_v53, %v994_v1 }
 0x456   :  { %v977_v54 = vpop.f32.mrf.mxu3 }
 0x457   :  { %v978_v57 = vadd.f32 %v977_v54, %v878_v0  ;;  %v991_v0 = vmax.f32 %v965_v8, 0.0 }
 0x459   :  { %v996_v47 = vmax.f32 %v978_v57, 0.0  ;;  %v1002_v2 = vpack.c.bf16 %v991_v0, %v990_v4 }
 0x45e   :  { %v979_v43 = vpop.f32.mrf.mxu3 }
 0x45f   :  { %v980_v46 = vadd.f32 %v979_v43, %v883_v10  ;;  %v1011_v10 = vpop.permute.xlu1 %1010 }
 0x460   :  { %v1013_v12 = vperm.slane %v1011_v10, 0 }
 0x461   :  { %v997_v49 = vmax.f32 %v980_v46, 0.0 }
 0x463   :  { %v1005_v59 = vpack.c.bf16 %v997_v49, %v996_v47 }
 0x465   :  { %1014 = vmatpush.bf16.msrb.mxu0 %v1005_v59 }
 0x469   :  { %1015 = vmatpush.bf16.msrb.mxu0 %v1004_v6 }
 0x46d   :  { %1016 = vmatpush.bf16.msrb.mxu0 %v1003_v16 }
 0x471   :  { %1017 = vmatpush.bf16.msrb.mxu0 %v1002_v2 }
 0x475   :  { %1018 = vmatpush.bf16.msrb.mxu0 %v1001_v37 }
 0x479   :  { %1019 = vmatpush.bf16.msrb.mxu0 %v1000_v27 }
 0x47d   :  { %1020 = vmatpush.bf16.msrb.mxu0 %v999_v26 }
 0x481   :  { %1021 = vmatpush.bf16.msrb.mxu0 %v998_v63 }
 0x484   :  { %1022 = vmatmul.bf16.vlgmr.msrb.gmra.mxu0 %v1006_v7 }
 0x501   :  { %v1023_v9 = vpop.f32.mrf.mxu0 }
 0x502   :  { %v1024_v17 = vadd.f32 %v1023_v9, %v1013_v12 }
 0x504   :  { %v1195_v18 = vmul.f32 -1.442695, %v1024_v17 }
 0x506   :  { %1234 = vpow2.f32 %v1195_v18 }
 0x509   :  { %v1025_v19 = vpop.f32.mrf.mxu0 }
 0x50c   :  { %v1235_v20 = vpop.eup %1234 }
 0x50d   :  { %v1030_v56 = vadd.f32 1.0, %v1235_v20 }
 0x50f   :  { %1236 = vrcp.f32 %v1030_v56  ;;  %v1042_v61 = vand.u32 2147483648, %v1030_v56  ;;  %v1040_v23 = vand.u32 2147483647, %v1030_v56  ;;  %vm1036_vm2 = vweird.f32 %v1030_v56 }
 0x511   :  { %v1043_v55 = vor.u32 1.1754944e-38, %v1042_v61  ;;  %vm1041_vm4 = vcmp.eq.f32.partialorder %v1040_v23, 8.507059e+37 }
 0x515   :  { %v1237_v21 = vpop.eup %1236 }
 0x516   :  { %v1032_v3 = vmul.f32 %v1237_v21, %v1030_v56  ;;  %vm1037_vm1 = vweird.f32 %v1237_v21 }
 0x517   :  { %vm1038_vm3 = vmor %vm1036_vm2, %vm1037_vm1 }
 0x518   :  { %v1033_v22 = vsub.f32 1.0, %v1032_v3 }
 0x51a   :  { %v1034_v63 = vmul.f32 %v1237_v21, %v1033_v22 }
 0x51c   :  { %v1035_v24 = vadd.f32 %v1237_v21, %v1034_v63 }
 0x51e   :  { %v1039_v62 = vsel %vm1038_vm3, %v1237_v21, %v1035_v24 }
 0x51f   :  { %v1044_v5 = vsel %vm1041_vm4, %v1043_v55, %v1039_v62 }
 0x520   :  { %1046 = vst [vmem:[%s1654_s11] sm:$0x1] %v1044_v5 }

</bundles_post_ra>
